<compile_context>
chip_gen: v7x
topology: tpu7x:2x2x1
jax: 0.10.0
libtpu: 0.0.40
codegen_flags: <defaults>
</compile_context>

<pallas_src>
import jax
import jax.numpy as jnp
from jax.experimental import pallas as pl
from jax.experimental.pallas import tpu as pltpu

LANE = 128  # TPU lane width; all feature-like dims are padded to a multiple of this.


def gnn_actor_kernel(a_ref, x_ref,
                     wg_ref, bg_ref,
                     w1_ref, b1_ref,
                     w2_ref, b2_ref,
                     w3_ref, b3_ref,
                     o_ref):
    # Per-tile block: a_ref [R, R] bf16 block-diagonal adjacency over BT graphs,
    # x_ref [R, CP] f32 stacked node features; weights bf16, biases f32.
    x_f32 = x_ref[...]                                   # kept f32 for the residual
    x_bf = x_f32.astype(jnp.bfloat16)
    a_bf = a_ref[...]

    # GCNConv: transform, propagate with block-diag normalized adjacency, bias, relu.
    xw = jnp.dot(x_bf, wg_ref[...], preferred_element_type=jnp.float32)          # [R, CP]
    h = jnp.dot(a_bf, xw.astype(jnp.bfloat16), preferred_element_type=jnp.float32)
    h = jnp.maximum(h + bg_ref[...], 0.0)                # f32 relu

    x1 = h + x_f32                                       # residual in f32

    x2 = jnp.maximum(
        jnp.dot(x1.astype(jnp.bfloat16), w1_ref[...],
                preferred_element_type=jnp.float32) + b1_ref[...], 0.0)
    x3 = jnp.maximum(
        jnp.dot(x2.astype(jnp.bfloat16), w2_ref[...],
                preferred_element_type=jnp.float32) + b2_ref[...], 0.0)

    # Lane-dense (R, 128) output tile; real 2 columns live in [:, :2].
    o_ref[...] = jnp.dot(x3.astype(jnp.bfloat16), w3_ref[...],
                         preferred_element_type=jnp.float32) + b3_ref[...]


def _round_up(v, m):
    return ((v + m - 1) // m) * m


def _pad_to(arr, shape):
    pads = [(0, t - s) for s, t in zip(arr.shape, shape)]
    return jnp.pad(arr, pads)


def gnn_actor_forward(a_hat, x, params, *, graphs_per_tile=None):
    """a_hat: [B, N, N] f32 normalized adjacency; x: [B, N, C] f32 node features.

    Returns [B, N, 2] f32 (Dirichlet concentration pre-activations)."""
    B, N, C = x.shape
    wg, bg, w1, b1, w2, b2, w3, b3 = params
    H = w1.shape[1]         # 32
    OUT = w3.shape[1]       # 2

    CP = _round_up(C, LANE)     # 128
    HP = _round_up(H, LANE)     # 128
    OP = _round_up(OUT, LANE)   # 128

    # How many graphs to fuse into one lane/sublane-dense slab per grid step.
    if graphs_per_tile is None:
        graphs_per_tile = max(1, min(B, LANE // N)) if N < LANE else 1
    BT = graphs_per_tile
    T = -(-B // BT)             # number of grid tiles (ceil)
    BP = T * BT                 # batch padded to a multiple of BT
    if BP != B:
        pad = BP - B
        x = jnp.pad(x, ((0, pad), (0, 0), (0, 0)))
        a_hat = jnp.pad(a_hat, ((0, pad), (0, 0), (0, 0)))
    R = BT * N                  # rows per tile (128 for N=16, BT=8)

    # Host-side glue: assemble the BT per-graph adjacencies of each tile into one
    # block-diagonal [R, R] matrix (cross-graph blocks are zero => math unchanged),
    # so the in-kernel propagation is a single 2-D MXU matmul.
    a_tiles = a_hat.astype(jnp.bfloat16).reshape(T, BT, N, N)
    eye_bt = jnp.eye(BT, dtype=jnp.bfloat16)
    a_bd = jnp.einsum('pq,tpij->tpiqj', eye_bt, a_tiles).reshape(T, R, R)

    # Zero-pad feature/hidden/output dims (mathematically a no-op) so all matmul
    # operands and the output tile are lane-dense. Weights cast to bf16 for the
    # MXU; x and biases stay f32 (f32 residual / accumulation).
    x_p = _pad_to(x, (BP, N, CP)).astype(jnp.float32).reshape(T, R, CP)
    wg_p = _pad_to(wg, (CP, CP)).astype(jnp.bfloat16)
    w1_p = _pad_to(w1, (CP, HP)).astype(jnp.bfloat16)
    w2_p = _pad_to(w2, (HP, HP)).astype(jnp.bfloat16)
    w3_p = _pad_to(w3, (HP, OP)).astype(jnp.bfloat16)
    bg_p = _pad_to(bg, (1, CP)).astype(jnp.float32)
    b1_p = _pad_to(b1, (1, HP)).astype(jnp.float32)
    b2_p = _pad_to(b2, (1, HP)).astype(jnp.float32)
    b3_p = _pad_to(b3, (1, OP)).astype(jnp.float32)

    out_padded = pl.pallas_call(
        gnn_actor_kernel,
        out_shape=jax.ShapeDtypeStruct((T, R, OP), jnp.float32),
        grid=(T,),
        in_specs=[
            pl.BlockSpec((None, R, R), lambda t: (t, 0, 0)),    # block-diag A_hat tile
            pl.BlockSpec((None, R, CP), lambda t: (t, 0, 0)),   # stacked node features
            pl.BlockSpec((CP, CP), lambda t: (0, 0)),           # Wg (grid-resident)
            pl.BlockSpec((1, CP), lambda t: (0, 0)),            # bg
            pl.BlockSpec((CP, HP), lambda t: (0, 0)),           # W1
            pl.BlockSpec((1, HP), lambda t: (0, 0)),            # b1
            pl.BlockSpec((HP, HP), lambda t: (0, 0)),           # W2
            pl.BlockSpec((1, HP), lambda t: (0, 0)),            # b2
            pl.BlockSpec((HP, OP), lambda t: (0, 0)),           # W3
            pl.BlockSpec((1, OP), lambda t: (0, 0)),            # b3
        ],
        out_specs=pl.BlockSpec((None, R, OP), lambda t: (t, 0, 0)),
        compiler_params=pltpu.CompilerParams(
            dimension_semantics=("parallel",)),                 # shard tiles across TCs
    )(a_bd, x_p, wg_p, bg_p, w1_p, b1_p, w2_p, b2_p, w3_p, b3_p)

    out = out_padded.reshape(BP, N, OP)[:B, :, :OUT]
    return out


def gnn_actor_reference(a_hat, x, params):
    """Pure-JAX f32 reference of the same forward (for correctness check)."""
    wg, bg, w1, b1, w2, b2, w3, b3 = params
    h = jnp.einsum('bij,bjc->bic', a_hat, x @ wg) + bg
    h = jnp.maximum(h, 0.0)
    x1 = h + x
    x2 = jnp.maximum(x1 @ w1 + b1, 0.0)
    x3 = jnp.maximum(x2 @ w2 + b2, 0.0)
    return x3 @ w3 + b3


def build_normalized_adjacency(edge_index, num_nodes):
    """Dense GCN adjacency: A_hat = D^{-1/2} (A + I) D^{-1/2} (glue, plain JAX)."""
    src, dst = edge_index
    A = jnp.zeros((num_nodes, num_nodes), jnp.float32)
    A = A.at[src, dst].set(1.0)
    A = A.at[dst, src].set(1.0)                       # treat graph as undirected
    idx = jnp.arange(num_nodes)
    A = A.at[idx, idx].set(1.0)                       # add self loops
    deg = jnp.sum(A, axis=1)
    d_inv_sqrt = jnp.where(deg > 0, 1.0 / jnp.sqrt(deg), 0.0)
    return A * d_inv_sqrt[:, None] * d_inv_sqrt[None, :]


def init_params(key, in_channels, hidden=32, out_dim=2):
    ks = jax.random.split(key, 8)
    scale = 0.1
    wg = scale * jax.random.normal(ks[0], (in_channels, in_channels), jnp.float32)
    bg = scale * jax.random.normal(ks[1], (1, in_channels), jnp.float32)
    w1 = scale * jax.random.normal(ks[2], (in_channels, hidden), jnp.float32)
    b1 = scale * jax.random.normal(ks[3], (1, hidden), jnp.float32)
    w2 = scale * jax.random.normal(ks[4], (hidden, hidden), jnp.float32)
    b2 = scale * jax.random.normal(ks[5], (1, hidden), jnp.float32)
    w3 = scale * jax.random.normal(ks[6], (hidden, out_dim), jnp.float32)
    b3 = scale * jax.random.normal(ks[7], (1, out_dim), jnp.float32)
    return (wg, bg, w1, b1, w2, b2, w3, b3)


if __name__ == "__main__":
    key = jax.random.PRNGKey(0)
    k_x, k_p, k_e = jax.random.split(key, 3)

    batch = 64            # B independent graphs (e.g. rollout timesteps)
    num_nodes = 16        # N graph nodes (e.g. regions)
    in_channels = 8       # node feature dimension
    # -> 8 graphs fused per tile (128 rows), grid=(8,) sharded across megacore TCs.

    # Deterministic synthetic batch of graphs + features.
    x = jax.random.normal(k_x, (batch, num_nodes, in_channels), jnp.float32)

    a_list = []
    ring_src = jnp.arange(num_nodes)
    ring_dst = (ring_src + 1) % num_nodes
    for b in range(batch):
        kb = jax.random.fold_in(k_e, b)
        extra_src = jax.random.randint(kb, (8,), 0, num_nodes)
        extra_dst = jax.random.randint(jax.random.fold_in(kb, 1), (8,), 0, num_nodes)
        edge_index = jnp.stack([jnp.concatenate([ring_src, extra_src]),
                                jnp.concatenate([ring_dst, extra_dst])], axis=0)
        a_list.append(build_normalized_adjacency(edge_index, num_nodes))
    a_hat = jnp.stack(a_list, axis=0)                 # [B, N, N]

    params = init_params(k_p, in_channels)

    out = gnn_actor_forward(a_hat, x, params)         # [B, N, 2]
    out = jax.block_until_ready(out)

    assert out.shape == (batch, num_nodes, 2) and out.dtype == jnp.float32
    assert bool(jnp.all(jnp.isfinite(out)))

    ref = gnn_actor_reference(a_hat, x, params)
    # bf16 MXU operands with f32 accumulation -> small, bounded deviation from f32 ref.
    assert bool(jnp.allclose(out, ref, atol=5e-2, rtol=5e-2))

    print("KERNEL_OK")
</pallas_src>

<mosaic_0001>
module attributes {stable_mosaic.version = 11 : i64} {
  func.func @gnn_actor_kernel(%arg0: i32, %arg1: memref<1x128x128xbf16, #tpu.memory_space<vmem>>, %arg2: memref<1x128x128xf32, #tpu.memory_space<vmem>>, %arg3: memref<128x128xbf16, #tpu.memory_space<vmem>>, %arg4: memref<1x128xf32, #tpu.memory_space<vmem>>, %arg5: memref<128x128xbf16, #tpu.memory_space<vmem>>, %arg6: memref<1x128xf32, #tpu.memory_space<vmem>>, %arg7: memref<128x128xbf16, #tpu.memory_space<vmem>>, %arg8: memref<1x128xf32, #tpu.memory_space<vmem>>, %arg9: memref<128x128xbf16, #tpu.memory_space<vmem>>, %arg10: memref<1x128xf32, #tpu.memory_space<vmem>>, %arg11: memref<1x128x128xf32, #tpu.memory_space<vmem>>) attributes {dimension_semantics = [#tpu.dimension_semantics<parallel>], iteration_bounds = array<i64: 8>, scalar_prefetch = 0 : i64, scratch_operands = 0 : i64, tpu.core_type = #tpu.core_type<tc>, window_params = [{transform_indices = @transform_0, window_bounds = array<i64: 1, 128, 128>}, {transform_indices = @transform_1, window_bounds = array<i64: 1, 128, 128>}, {pipeline_mode = #tpu.pipeline_mode<synchronous>, transform_indices = @transform_2, window_bounds = array<i64: 128, 128>}, {pipeline_mode = #tpu.pipeline_mode<synchronous>, transform_indices = @transform_3, window_bounds = array<i64: 1, 128>}, {pipeline_mode = #tpu.pipeline_mode<synchronous>, transform_indices = @transform_4, window_bounds = array<i64: 128, 128>}, {pipeline_mode = #tpu.pipeline_mode<synchronous>, transform_indices = @transform_5, window_bounds = array<i64: 1, 128>}, {pipeline_mode = #tpu.pipeline_mode<synchronous>, transform_indices = @transform_6, window_bounds = array<i64: 128, 128>}, {pipeline_mode = #tpu.pipeline_mode<synchronous>, transform_indices = @transform_7, window_bounds = array<i64: 1, 128>}, {pipeline_mode = #tpu.pipeline_mode<synchronous>, transform_indices = @transform_8, window_bounds = array<i64: 128, 128>}, {pipeline_mode = #tpu.pipeline_mode<synchronous>, transform_indices = @transform_9, window_bounds = array<i64: 1, 128>}, {transform_indices = @transform_10, window_bounds = array<i64: 1, 128, 128>}]} {
    %c0 = arith.constant 0 : index
    %c0_0 = arith.constant 0 : index
    %c0_1 = arith.constant 0 : index
    %0 = vector.load %arg2[%c0, %c0_0, %c0_1] : memref<1x128x128xf32, #tpu.memory_space<vmem>>, vector<1x128x128xf32>
    %1 = vector.shape_cast %0 : vector<1x128x128xf32> to vector<128x128xf32>
    %2 = arith.truncf %1 : vector<128x128xf32> to vector<128x128xbf16>
    %c0_2 = arith.constant 0 : index
    %c0_3 = arith.constant 0 : index
    %c0_4 = arith.constant 0 : index
    %3 = vector.load %arg1[%c0_2, %c0_3, %c0_4] : memref<1x128x128xbf16, #tpu.memory_space<vmem>>, vector<1x128x128xbf16>
    %4 = vector.shape_cast %3 : vector<1x128x128xbf16> to vector<128x128xbf16>
    %c0_5 = arith.constant 0 : index
    %c0_6 = arith.constant 0 : index
    %5 = vector.load %arg3[%c0_5, %c0_6] : memref<128x128xbf16, #tpu.memory_space<vmem>>, vector<128x128xbf16>
    %cst = arith.constant dense<0.000000e+00> : vector<128x128xf32>
    %6 = tpu.matmul %2, %5, %cst {dimension_numbers = #tpu.dot_dimension_numbers<[1], [0], [0], [1], [0, 0, 1, 1], [], []>} : vector<128x128xbf16>, vector<128x128xbf16>, vector<128x128xf32> -> vector<128x128xf32>
    %7 = arith.truncf %6 : vector<128x128xf32> to vector<128x128xbf16>
    %cst_7 = arith.constant dense<0.000000e+00> : vector<128x128xf32>
    %8 = tpu.matmul %4, %7, %cst_7 {dimension_numbers = #tpu.dot_dimension_numbers<[1], [0], [0], [1], [0, 0, 1, 1], [], []>} : vector<128x128xbf16>, vector<128x128xbf16>, vector<128x128xf32> -> vector<128x128xf32>
    %c0_8 = arith.constant 0 : index
    %c0_9 = arith.constant 0 : index
    %9 = vector.load %arg4[%c0_8, %c0_9] : memref<1x128xf32, #tpu.memory_space<vmem>>, vector<1x128xf32>
    %10 = vector.broadcast %9 : vector<1x128xf32> to vector<128x128xf32>
    %11 = arith.addf %8, %10 : vector<128x128xf32>
    %cst_10 = arith.constant 0.000000e+00 : f32
    %12 = vector.broadcast %cst_10 : f32 to vector<128x128xf32>
    %13 = arith.maximumf %11, %12 : vector<128x128xf32>
    %14 = arith.addf %13, %1 : vector<128x128xf32>
    %15 = arith.truncf %14 : vector<128x128xf32> to vector<128x128xbf16>
    %c0_11 = arith.constant 0 : index
    %c0_12 = arith.constant 0 : index
    %16 = vector.load %arg5[%c0_11, %c0_12] : memref<128x128xbf16, #tpu.memory_space<vmem>>, vector<128x128xbf16>
    %cst_13 = arith.constant dense<0.000000e+00> : vector<128x128xf32>
    %17 = tpu.matmul %15, %16, %cst_13 {dimension_numbers = #tpu.dot_dimension_numbers<[1], [0], [0], [1], [0, 0, 1, 1], [], []>} : vector<128x128xbf16>, vector<128x128xbf16>, vector<128x128xf32> -> vector<128x128xf32>
    %c0_14 = arith.constant 0 : index
    %c0_15 = arith.constant 0 : index
    %18 = vector.load %arg6[%c0_14, %c0_15] : memref<1x128xf32, #tpu.memory_space<vmem>>, vector<1x128xf32>
    %19 = vector.broadcast %18 : vector<1x128xf32> to vector<128x128xf32>
    %20 = arith.addf %17, %19 : vector<128x128xf32>
    %cst_16 = arith.constant 0.000000e+00 : f32
    %21 = vector.broadcast %cst_16 : f32 to vector<128x128xf32>
    %22 = arith.maximumf %20, %21 : vector<128x128xf32>
    %23 = arith.truncf %22 : vector<128x128xf32> to vector<128x128xbf16>
    %c0_17 = arith.constant 0 : index
    %c0_18 = arith.constant 0 : index
    %24 = vector.load %arg7[%c0_17, %c0_18] : memref<128x128xbf16, #tpu.memory_space<vmem>>, vector<128x128xbf16>
    %cst_19 = arith.constant dense<0.000000e+00> : vector<128x128xf32>
    %25 = tpu.matmul %23, %24, %cst_19 {dimension_numbers = #tpu.dot_dimension_numbers<[1], [0], [0], [1], [0, 0, 1, 1], [], []>} : vector<128x128xbf16>, vector<128x128xbf16>, vector<128x128xf32> -> vector<128x128xf32>
    %c0_20 = arith.constant 0 : index
    %c0_21 = arith.constant 0 : index
    %26 = vector.load %arg8[%c0_20, %c0_21] : memref<1x128xf32, #tpu.memory_space<vmem>>, vector<1x128xf32>
    %27 = vector.broadcast %26 : vector<1x128xf32> to vector<128x128xf32>
    %28 = arith.addf %25, %27 : vector<128x128xf32>
    %cst_22 = arith.constant 0.000000e+00 : f32
    %29 = vector.broadcast %cst_22 : f32 to vector<128x128xf32>
    %30 = arith.maximumf %28, %29 : vector<128x128xf32>
    %31 = arith.truncf %30 : vector<128x128xf32> to vector<128x128xbf16>
    %c0_23 = arith.constant 0 : index
    %c0_24 = arith.constant 0 : index
    %32 = vector.load %arg9[%c0_23, %c0_24] : memref<128x128xbf16, #tpu.memory_space<vmem>>, vector<128x128xbf16>
    %cst_25 = arith.constant dense<0.000000e+00> : vector<128x128xf32>
    %33 = tpu.matmul %31, %32, %cst_25 {dimension_numbers = #tpu.dot_dimension_numbers<[1], [0], [0], [1], [0, 0, 1, 1], [], []>} : vector<128x128xbf16>, vector<128x128xbf16>, vector<128x128xf32> -> vector<128x128xf32>
    %c0_26 = arith.constant 0 : index
    %c0_27 = arith.constant 0 : index
    %34 = vector.load %arg10[%c0_26, %c0_27] : memref<1x128xf32, #tpu.memory_space<vmem>>, vector<1x128xf32>
    %35 = vector.broadcast %34 : vector<1x128xf32> to vector<128x128xf32>
    %36 = arith.addf %33, %35 : vector<128x128xf32>
    %c0_28 = arith.constant 0 : index
    %c0_29 = arith.constant 0 : index
    %c0_30 = arith.constant 0 : index
    %37 = vector.load %arg11[%c0_28, %c0_29, %c0_30] : memref<1x128x128xf32, #tpu.memory_space<vmem>>, vector<1x128x128xf32>
    %38 = vector.shape_cast %37 : vector<1x128x128xf32> to vector<128x128xf32>
    %39 = vector.shape_cast %36 : vector<128x128xf32> to vector<1x128x128xf32>
    tpu.vector_store %arg11[%c0_28, %c0_29, %c0_30], %39 {strides = array<i32>} : memref<1x128x128xf32, #tpu.memory_space<vmem>>, vector<1x128x128xf32>,
    return
  }
  func.func @transform_0(%arg0: i32) -> (i32, i32, i32) {
    %c0_i32 = arith.constant 0 : i32
    %c0_i32_0 = arith.constant 0 : i32
    %c0_i32_1 = arith.constant 0 : i32
    return %arg0, %c0_i32, %c0_i32_0 : i32, i32, i32
  }
  func.func @transform_1(%arg0: i32) -> (i32, i32, i32) {
    %c0_i32 = arith.constant 0 : i32
    %c0_i32_0 = arith.constant 0 : i32
    %c0_i32_1 = arith.constant 0 : i32
    return %arg0, %c0_i32, %c0_i32_0 : i32, i32, i32
  }
  func.func @transform_2(%arg0: i32) -> (i32, i32) {
    %c0_i32 = arith.constant 0 : i32
    %c0_i32_0 = arith.constant 0 : i32
    %c0_i32_1 = arith.constant 0 : i32
    return %c0_i32, %c0_i32_0 : i32, i32
  }
  func.func @transform_3(%arg0: i32) -> (i32, i32) {
    %c0_i32 = arith.constant 0 : i32
    %c0_i32_0 = arith.constant 0 : i32
    %c0_i32_1 = arith.constant 0 : i32
    return %c0_i32, %c0_i32_0 : i32, i32
  }
  func.func @transform_4(%arg0: i32) -> (i32, i32) {
    %c0_i32 = arith.constant 0 : i32
    %c0_i32_0 = arith.constant 0 : i32
    %c0_i32_1 = arith.constant 0 : i32
    return %c0_i32, %c0_i32_0 : i32, i32
  }
  func.func @transform_5(%arg0: i32) -> (i32, i32) {
    %c0_i32 = arith.constant 0 : i32
    %c0_i32_0 = arith.constant 0 : i32
    %c0_i32_1 = arith.constant 0 : i32
    return %c0_i32, %c0_i32_0 : i32, i32
  }
  func.func @transform_6(%arg0: i32) -> (i32, i32) {
    %c0_i32 = arith.constant 0 : i32
    %c0_i32_0 = arith.constant 0 : i32
    %c0_i32_1 = arith.constant 0 : i32
    return %c0_i32, %c0_i32_0 : i32, i32
  }
  func.func @transform_7(%arg0: i32) -> (i32, i32) {
    %c0_i32 = arith.constant 0 : i32
    %c0_i32_0 = arith.constant 0 : i32
    %c0_i32_1 = arith.constant 0 : i32
    return %c0_i32, %c0_i32_0 : i32, i32
  }
  func.func @transform_8(%arg0: i32) -> (i32, i32) {
    %c0_i32 = arith.constant 0 : i32
    %c0_i32_0 = arith.constant 0 : i32
    %c0_i32_1 = arith.constant 0 : i32
    return %c0_i32, %c0_i32_0 : i32, i32
  }
  func.func @transform_9(%arg0: i32) -> (i32, i32) {
    %c0_i32 = arith.constant 0 : i32
    %c0_i32_0 = arith.constant 0 : i32
    %c0_i32_1 = arith.constant 0 : i32
    return %c0_i32, %c0_i32_0 : i32, i32
  }
  func.func @transform_10(%arg0: i32) -> (i32, i32, i32) {
    %c0_i32 = arith.constant 0 : i32
    %c0_i32_0 = arith.constant 0 : i32
    %c0_i32_1 = arith.constant 0 : i32
    return %arg0, %c0_i32, %c0_i32_0 : i32, i32, i32
  }
}

</mosaic_0001>

<bundles_post_ra>
// kernel: tpu_custom_call.1
= control target key start
LH: loop header
LB: loop body
LE: loop exit
PB: predicated region body
PF: predicated region fallthrough
CT: control target
= control target key end

     0   :  { %s2909_s0 = inlined_call_operand.hbm [shape: bf16[8,128,128], index: 0, kind: input, shape index: {}]   ;;  %s2910_s1 = inlined_call_operand.hbm [shape: f32[8,128,128], index: 1, kind: input, shape index: {}]   ;;  %s2911_s2 = inlined_call_operand.hbm [shape: bf16[128,128], index: 2, kind: input, shape index: {}]   ;;  %s2912_s3 = inlined_call_operand.vmem [shape: f32[1,128], index: 3, kind: input, shape index: {}]   ;;  %s2913_s4 = inlined_call_operand.hbm [shape: bf16[128,128], index: 4, kind: input, shape index: {}]   ;;  %s2914_s5 = inlined_call_operand.vmem [shape: f32[1,128], index: 5, kind: input, shape index: {}]   ;;  %s2915_s6 = inlined_call_operand.hbm [shape: bf16[128,128], index: 6, kind: input, shape index: {}]   ;;  %s2916_s7 = inlined_call_operand.vmem [shape: f32[1,128], index: 7, kind: input, shape index: {}]   ;;  %s2917_s8 = inlined_call_operand.hbm [shape: bf16[128,128], index: 8, kind: input, shape index: {}]   ;;  %s2918_s9 = inlined_call_operand.vmem [shape: f32[1,128], index: 9, kind: input, shape index: {}]   ;;  %s2919_s10 = inlined_call_operand.hbm [shape: f32[8,128,128], index: 10, kind: output, shape index: {}]  }
   0x1   :  { %2928 = sst [smem:[#allocation22_spill]] %s2909_s0 }
   0x2   :  { %2929 = sst [smem:[#allocation23_spill]] %s2911_s2 }
   0x3   :  { %2930 = sst [smem:[#allocation24_spill]] %s2913_s4 }
   0x4   :  { %2931 = sst [smem:[#allocation25_spill]] %s2915_s6 }
   0x5   :  { %2932 = sst [smem:[#allocation26_spill]] %s2918_s9 }
   0x6   :  { %2933 = sst [smem:[#allocation27_spill]] %s2919_s10 }
   0x7   :  { %15 = vsyncpa [#allocation3], 0 }
   0x8   :  { %17 = vsyncpa [#allocation3 + $0x1], 0 }
   0x9   :  { %18 = vsyncpa [#allocation6], 0 }
   0xa   :  { %20 = vsyncpa [#allocation6 + $0x1], 0 }
   0xb   :  { %21 = vsyncpa [#allocation9], 0 }
   0xc   :  { %22 = vsyncpa [#allocation12], 0 }
   0xd   :  { %23 = vsyncpa [#allocation4], 0 }
   0xe   :  { %25 = vsyncpa [#allocation4 + $0x1], 0  ;;  %s2385_s13 = smov 0   ;;  %s2387_s14 = smov 0  }
   0xf   :  { %s2389_s15 = smov 0   ;;  %s2391_s16 = smov 0  }
  0x10 LB: > { %2934 = sst [smem:[#allocation20_spill]] %s2303_s13  ;;  %s2406_s17 = sadd.s32 4294967295, %s2315_s16   ;;  %s2315_s16 = sphi %s2391_s16, %s2967_s16   ;;  %s2311_s15 = sphi %s2389_s15, %s2966_s15   ;;  %s2307_s14 = sphi %s2387_s14, %s2965_s14   ;;  %s2303_s13 = sphi %s2385_s13, %s2964_s13  }
  0x11   : > { %s1594_s18 = sadd.s32 4294967294, %s2315_s16   ;;  %p51_p0 = scmp.ne.s32.totalorder %s2307_s14, %s2303_s13 }
  0x12   : > { %p2920_p1 = scmp.eq.s32.totalorder %s2406_s17, 0  ;;  %p275_p3 = scmp.eq.s32.totalorder %s1594_s18, 7 }
  0x13   : > { %p1595_p5 = scmp.ge.s32.totalorder %s2315_s16, 1  ;;  %p282_p7 = scmp.lt.s32.totalorder %s2315_s16, 9 }
  0x14   : > { %p2415_p4 = por %p2920_p1, %p51_p0  ;;  %p2420_p6 = por %p275_p3, %p51_p0 }
  0x15   : > { %p2425_p8 = pnand %p1595_p5, %p282_p7  ;;  %s2317_s22 = smov [#allocation7]  }
  0x16   : > { %s2935_s19 = scalar_select %p2415_p4, 1, 0 }
  0x17   : > { %s2936_s20 = scalar_select %p2420_p6, 1, 0 }
  0x18   : > { %s2938_s21 = scalar_select %p2425_p8, 1, 0 }
  0x19   : > { %2937 = sst [smem:[#allocation21_spill]] %s2936_s20  ;;  %s294_s23 = sshll.u32 %s2317_s22, 4  ;;  %s2429_s23 = int_to_ptr.vmem [resolvable:$true] %s294_s23 }
  0x1a   : > { %p1945_p9 = pneg %p2425_p8  ;;  %s2318_s25 = smov [#allocation8]  }
  0x1b   : > { %s310_s26 = sshll.u32 %s2318_s25, 4  ;;  %s2319_s27 = smov [#allocation10]   ;;  %s2439_s26 = int_to_ptr.vmem [resolvable:$true] %s310_s26 }
  0x1c   : > { %p2435_p10 = pnand %p1945_p9, %p2920_p1  ;;  %s2441_s28 = sshll.u32 %s2319_s27, 4  ;;  %s327_s28 = int_to_ptr.vmem [resolvable:$true] %s2441_s28 }
  0x1d   : > { %s2940_s2 = sld [smem:[#allocation23_spill]] }
  0x1e   : > { %p2451_p12 = pneg %p2435_p10 }
  0x23   : > { %s2061_s11 = scalar_lea.hbm %s2940_s2, 1024 }
  0x24   : > { %p2062_p11 = scmp.ne.s32.totalorder %s2940_s2, %s2061_s11  ;;  %p2068_p3 = scmp.lt.u32.totalorder %s2061_s11, %s2940_s2 }
  0x26   : > { %p2064_p13 = pnand %p2451_p12, %p2062_p11 }
  0x28   : > { %p2065_p0 = pneg %p2064_p13 }
  0x2a   : > { %p2070_p5 = pnand %p2068_p3, %p2065_p0 }
  0x2c   : > { %2073 = shalt.err (!%p2070_p5)
}
  0x2d   : > { %s2074_s29 = scalar_lea.vmem %s2429_s23, 1024  ;;  %p2082_p2 = scmp.lt.s32.totalorder %s2429_s23, %s2429_s23 }
  0x2e   : > { %p2075_p7 = scmp.ne.s32.totalorder %s2429_s23, %s2074_s29  ;;  %p2083_p6 = scmp.lt.s32.totalorder %s2074_s29, %s2074_s29 }
  0x30   : > { %p2077_p9 = pnand %p2075_p7, %p2451_p12  ;;  %p2084_p11 = por %p2083_p6, %p2082_p2 }
  0x32   : > { %p2078_p1 = pneg %p2077_p9 }
  0x34   : > { %p2085_p13 = pnand %p2084_p11, %p2078_p1 }
  0x36   : > { %2088 = shalt.err (!%p2085_p13)
}
  0x37   : > { %s2926_s30 = smov 64   ;;  %s2927_s11 = smov 4  }
  0x38   : > { %1948 = dma.hbm_to_vmem [thread:$0]  (!%p2435_p10), %s2940_s2, 1024, %s2429_s23, [#allocation6], %s2926_s30, %s2926_s30, %s2927_s11  }
  0x39   : > { %s2942_s4 = sld [smem:[#allocation24_spill]] }
  0x3f   : > { %s2089_s29 = scalar_lea.hbm %s2942_s4, 1024 }
  0x40   : > { %p2090_p1 = scmp.ne.s32.totalorder %s2942_s4, %s2089_s29  ;;  %p2096_p0 = scmp.lt.u32.totalorder %s2089_s29, %s2942_s4 }
  0x42   : > { %p2092_p2 = pnand %p2090_p1, %p2451_p12 }
  0x44   : > { %p2093_p6 = pneg %p2092_p2 }
  0x46   : > { %p2098_p3 = pnand %p2096_p0, %p2093_p6 }
  0x48   : > { %2101 = shalt.err (!%p2098_p3)
}
  0x49   : > { %s2102_s23 = scalar_lea.vmem %s2439_s26, 1024  ;;  %p2110_p11 = scmp.lt.s32.totalorder %s2439_s26, %s2439_s26 }
  0x4a   : > { %p2103_p5 = scmp.ne.s32.totalorder %s2439_s26, %s2102_s23  ;;  %p2111_p13 = scmp.lt.s32.totalorder %s2102_s23, %s2102_s23 }
  0x4c   : > { %p2105_p7 = pnand %p2103_p5, %p2451_p12  ;;  %p2112_p1 = por %p2111_p13, %p2110_p11 }
  0x4e   : > { %p2106_p9 = pneg %p2105_p7 }
  0x50   : > { %p2113_p2 = pnand %p2112_p1, %p2106_p9 }
  0x52   : > { %2116 = shalt.err (!%p2113_p2)
}
  0x53   : > { %1951 = dma.hbm_to_vmem [thread:$0]  (!%p2435_p10), %s2942_s4, 1024, %s2439_s26, [#allocation9], %s2926_s30, %s2926_s30, %s2927_s11  }
  0x54   : > { %s2943_s6 = sld [smem:[#allocation25_spill]] }
  0x5a   : > { %s2117_s12 = scalar_lea.hbm %s2943_s6, 1024 }
  0x5b   : > { %p2118_p6 = scmp.ne.s32.totalorder %s2943_s6, %s2117_s12  ;;  %p2124_p5 = scmp.lt.u32.totalorder %s2117_s12, %s2943_s6 }
  0x5d   : > { %p2120_p0 = pnand %p2118_p6, %p2451_p12 }
  0x5f   : > { %p2121_p3 = pneg %p2120_p0 }
  0x61   : > { %p2126_p7 = pnand %p2124_p5, %p2121_p3 }
  0x63   : > { %2129 = shalt.err (!%p2126_p7)
}
  0x64   : > { %s2130_s23 = scalar_lea.vmem %s327_s28, 1024  ;;  %p2138_p1 = scmp.lt.s32.totalorder %s327_s28, %s327_s28 }
  0x65   : > { %p2131_p9 = scmp.ne.s32.totalorder %s327_s28, %s2130_s23  ;;  %p2139_p2 = scmp.lt.s32.totalorder %s2130_s23, %s2130_s23 }
  0x67   : > { %p2133_p11 = pnand %p2131_p9, %p2451_p12  ;;  %p2140_p4 = por %p2139_p2, %p2138_p1 }
  0x69   : > { %p2134_p13 = pneg %p2133_p11 }
  0x6b   : > { %p2141_p8 = pnand %p2140_p4, %p2134_p13 }
  0x6d   : > { %2144 = shalt.err (!%p2141_p8)
}
  0x6e   : > { %1954 = dma.hbm_to_vmem [thread:$0]  (!%p2435_p10), %s2943_s6, 1024, %s327_s28, [#allocation9], %s2926_s30, %s2926_s30, %s2927_s11  }
  0x6f   : > { %s2322_s10 = smov [#allocation11]   ;;  %s2145_s18 = scalar_lea.hbm %s2917_s8, 1024 }
  0x70   : > { %s342_s13 = sshll.u32 %s2322_s10, 4  ;;  %p2146_p4 = scmp.ne.s32.totalorder %s2917_s8, %s2145_s18  ;;  %s343_s13 = int_to_ptr.vmem [resolvable:$true] %s342_s13 }
  0x71   : > { %p2152_p0 = scmp.lt.u32.totalorder %s2145_s18, %s2917_s8 }
  0x72   : > { %p2148_p8 = pnand %p2146_p4, %p2451_p12 }
  0x74   : > { %p2149_p6 = pneg %p2148_p8 }
  0x76   : > { %p2154_p3 = pnand %p2152_p0, %p2149_p6 }
  0x78   : > { %2157 = shalt.err (!%p2154_p3)
}
  0x79   : > { %s2158_s28 = scalar_lea.vmem %s343_s13, 1024  ;;  %p2166_p11 = scmp.lt.s32.totalorder %s343_s13, %s343_s13 }
  0x7a   : > { %p2159_p5 = scmp.ne.s32.totalorder %s343_s13, %s2158_s28  ;;  %p2167_p13 = scmp.lt.s32.totalorder %s2158_s28, %s2158_s28 }
  0x7c   : > { %p2161_p7 = pnand %p2159_p5, %p2451_p12  ;;  %p2168_p1 = por %p2167_p13, %p2166_p11 }
  0x7e   : > { %p2162_p9 = pneg %p2161_p7 }
  0x80   : > { %p2169_p2 = pnand %p2168_p1, %p2162_p9 }
  0x82   : > { %2172 = shalt.err (!%p2169_p2)
}
  0x83   : > { %1957 = dma.hbm_to_vmem [thread:$0]  (!%p2435_p10), %s2917_s8, 1024, %s343_s13, [#allocation12], %s2926_s30, %s2926_s30, %s2927_s11  }
  0x84   : > { %s2545_s22 = sadd.s32 1, %s2315_s16   ;;  %s38_s24 = sadd.s32 1, %s2311_s15 }
  0x85   : > { %s35_s10 = ssub.s32 %s2315_s16, %s2545_s22  ;;  %p45_p12 = scmp.ne.s32.totalorder %s2311_s15, %s2307_s14 }
  0x86   : > { %p36_p4 = scmp.eq.s32.totalorder %s35_s10, 0  ;;  %p46_p8 = scmp.eq.s32.totalorder %s2315_s16, 0 }
  0x87   : > { %p2944_p6 = scmp.eq.s32.totalorder %s2406_s17, 7  ;;  %p1973_p3 = scmp.lt.s32.totalorder %s2315_s16, 8 }
  0x88   : > { %s2561_s12 = scalar_select %p36_p4, %s2311_s15, %s38_s24  }
  0x89   : > { %p2555_p0 = por %p2944_p6, %p45_p12  ;;  %p47_p5 = por %p46_p8, %p45_p12 }
  0x8a   : > { %s2564_s18 = sand.u32 1, %s2311_s15   ;;  %s1664_s25 = sshll.u32 %s2315_s16, 10 }
  0x8b   : > { %s1601_s13 = sshll.u32 %s2564_s18, 6  ;;  %s2946_s0 = sld [smem:[#allocation22_spill]] }
  0x8c   : > { %s363_s28 = scalar_lea.vmem [#allocation2], %s1601_s13  ;;  %p2575_p10 = pnand %p1973_p3, %p47_p5 }
  0x8d   : > { %s370_s26 = sshll.u32 %s363_s28, 4  ;;  %s1604_s10 = sshll.u32 %s2564_s18, 7  ;;  %s2573_s26 = int_to_ptr.vmem [resolvable:$true] %s370_s26 }
  0x8e   : > { %s360_s30 = scalar_lea.sflag [#allocation3], %s2564_s18  ;;  %p2175_p9 = pneg %p2575_p10 }
  0x91   : > { %s2571_s23 = scalar_lea.hbm %s2946_s0, %s1664_s25  ;;  %s2178_s29 = scalar_lea.hbm %s2946_s0, 8192 }
  0x92   : > { %s2173_s27 = scalar_lea.hbm %s2571_s23, 1024  ;;  %p2179_p1 = scmp.lt.u32.totalorder %s2571_s23, %s2946_s0 }
  0x93   : > { %p2174_p7 = scmp.ne.s32.totalorder %s2571_s23, %s2173_s27  ;;  %p2180_p2 = scmp.lt.u32.totalorder %s2178_s29, %s2173_s27 }
  0x94   : > { %p2182_p4 = scmp.lt.u32.totalorder %s2173_s27, %s2571_s23 }
  0x95   : > { %p2176_p11 = pnand %p2175_p9, %p2174_p7  ;;  %p2181_p12 = por %p2180_p2, %p2179_p1 }
  0x97   : > { %p2177_p13 = pneg %p2176_p11  ;;  %p2183_p8 = por %p2182_p4, %p2181_p12 }
  0x99   : > { %p2184_p6 = pnand %p2183_p8, %p2177_p13 }
  0x9b   : > { %2187 = shalt.err (!%p2184_p6)
}
  0x9c   : > { %s2188_s24 = scalar_lea.vmem %s2573_s26, 1024  ;;  %s2323_s13 = smov [#allocation2]  }
  0x9d   : > { %p2189_p3 = scmp.ne.s32.totalorder %s2573_s26, %s2188_s24  ;;  %s2193_s25 = sshll.u32 %s2323_s13, 4  ;;  %s2194_s25 = int_to_ptr.vmem [resolvable:$false] %s2193_s25 }
  0x9e   : > { %s2195_s11 = scalar_lea.vmem %s2194_s25, 2048  ;;  %p2196_p11 = scmp.lt.s32.totalorder %s2573_s26, %s2194_s25 }
  0x9f   : > { %p2191_p5 = pnand %p2189_p3, %p2175_p9  ;;  %p2197_p1 = scmp.lt.s32.totalorder %s2195_s11, %s2188_s24 }
  0xa1   : > { %p2192_p7 = pneg %p2191_p5  ;;  %p2198_p2 = por %p2197_p1, %p2196_p11 }
  0xa3   : > { %p2199_p12 = pnand %p2198_p2, %p2192_p7 }
  0xa5   : > { %2202 = shalt.err (!%p2199_p12)
}
  0xa6   : > { %s2948_s27 = smov 4   ;;  %s2949_s29 = smov 64  }
  0xa7   : > { %1961 = dma.hbm_to_vmem [thread:$0]  (!%p2575_p10), %s2571_s23, 1024, %s2573_s26, %s360_s30, %s2949_s29, %s2949_s29, %s2948_s27  }
  0xa8   : > { %s1665_s28 = sshll.u32 %s2315_s16, 11  ;;  %s384_s11 = scalar_lea.vmem [#allocation5], %s1604_s10 }
  0xa9   : > { %s2616_s25 = scalar_lea.hbm %s2910_s1, %s1665_s28  ;;  %s391_s0 = sshll.u32 %s384_s11, 4  ;;  %s2620_s0 = int_to_ptr.vmem [resolvable:$true] %s391_s0 }
  0xaa   : > { %s2950_s2 = sand.u32 1, %s2315_s16   ;;  %s2203_s6 = scalar_lea.hbm %s2616_s25, 2048 }
  0xab   : > { %s2624_s4 = scalar_lea.sflag [#allocation6], %s2950_s2  ;;  %p2204_p13 = scmp.ne.s32.totalorder %s2616_s25, %s2203_s6 }
  0xac   : > { %s2208_s18 = scalar_lea.hbm %s2910_s1, 16384  ;;  %p2209_p6 = scmp.lt.u32.totalorder %s2616_s25, %s2910_s1 }
  0xad   : > { %p2206_p4 = pnand %p2204_p13, %p2175_p9  ;;  %p2210_p3 = scmp.lt.u32.totalorder %s2208_s18, %s2203_s6 }
  0xae   : > { %p2212_p7 = scmp.lt.u32.totalorder %s2203_s6, %s2616_s25 }
  0xaf   : > { %p2207_p8 = pneg %p2206_p4  ;;  %p2211_p5 = por %p2210_p3, %p2209_p6 }
  0xb1   : > { %p2213_p11 = por %p2212_p7, %p2211_p5 }
  0xb3   : > { %p2214_p1 = pnand %p2213_p11, %p2207_p8 }
  0xb5   : > { %2217 = shalt.err (!%p2214_p1)
}
  0xb6   : > { %s2218_s2 = scalar_lea.vmem %s2620_s0, 2048  ;;  %s2324_s10 = smov [#allocation5]  }
  0xb7   : > { %p2219_p2 = scmp.ne.s32.totalorder %s2620_s0, %s2218_s2  ;;  %s2223_s29 = sshll.u32 %s2324_s10, 4  ;;  %s2224_s29 = int_to_ptr.vmem [resolvable:$false] %s2223_s29 }
  0xb8   : > { %s2225_s28 = scalar_lea.vmem %s2224_s29, 4096  ;;  %p2226_p4 = scmp.lt.s32.totalorder %s2620_s0, %s2224_s29 }
  0xb9   : > { %p2221_p12 = pnand %p2219_p2, %p2175_p9  ;;  %p2227_p6 = scmp.lt.s32.totalorder %s2225_s28, %s2218_s2 }
  0xbb   : > { %p2222_p13 = pneg %p2221_p12  ;;  %p2228_p3 = por %p2227_p6, %p2226_p4 }
  0xbd   : > { %p2229_p5 = pnand %p2228_p3, %p2222_p13 }
  0xbf   : > { %2232 = shalt.err (!%p2229_p5)
}
  0xc0   : > { %s2325_s6 = smov 128   ;;  %s2326_s13 = smov 8  }
  0xc1   : > { %1964 = dma.hbm_to_vmem [thread:$0]  (!%p2575_p10), %s2616_s25, 2048, %s2620_s0, %s2624_s4, %s2325_s6, %s2325_s6, %s2326_s13  }
  0xc2   : > { %p2951_p9 = scmp.ne.s32.totalorder %s2938_s21, 0 }
  0xc3   : > { %s2653_s24 = sand.u32 (!%p2951_p9), 1, %s2307_s14   ;;  %p2952_p8 = scmp.ne.s32.totalorder (!%p2951_p9), %s2935_s19, 0 }
  0xc4   : > { %403 = sbr.rel (%p2951_p9) target bundleno = 1423 (0x58f), region = 60  ;;  %s1608_s11 = sshll.u32 (!%p2951_p9), %s2653_s24, 6 }
  0xc5   : > { %s406_s30 = scalar_lea.sflag (!%p2951_p9), [#allocation3], %s2653_s24  ;;  %s2657_s23 = scalar_lea.vmem (!%p2951_p9), [#allocation2], %s1608_s11 }
  0xcb   : > { %2278 = dma.done.wait (%p2952_p8), %s406_s30, 1024  }
  0xcc   : > { %2280 = vsyncadd (%p2952_p8), %s406_s30, 4294966272  ;;  %s414_s0 = sand.u32 1, %s2406_s17   ;;  %s1609_s4 = sshll.u32 %s2653_s24, 7 }
  0xcd   : > { %s415_s21 = scalar_lea.sflag [#allocation6], %s414_s0  ;;  %s2667_s9 = scalar_lea.vmem [#allocation5], %s1609_s4 }
  0xce   : > { %2282 = dma.done.wait (%p2952_p8), %s415_s21, 2048  }
  0xcf   : > { %2284 = vsyncadd (%p2952_p8), %s415_s21, 4294965248  ;;  %p2953_p10 = scmp.eq.s32.totalorder %s2406_s17, 0 }
  0xd1   : > { %2286 = dma.done.wait (%p2953_p10), [#allocation6], 1024   ;;  %p2954_p7 = pmov %p2953_p10 }
  0xd3   : > { %2288 = vsyncadd (%p2954_p7), [#allocation6], 4294966272  ;;  %p2955_p11 = pmov %p2954_p7 }
  0xd4   : > { %p2956_p1 = pmov %p2954_p7 }
  0xd5   : > { %2290 = dma.done.wait (%p2955_p11), [#allocation9], 2048  }
  0xd6   : > { %2292 = vsyncadd (%p2956_p1), [#allocation9], 4294965248  ;;  %p2957_p2 = pmov %p2956_p1 }
  0xd7   : > { %p2958_p12 = pmov %p2956_p1 }
  0xd8   : > { %2294 = dma.done.wait (%p2957_p2), [#allocation12], 1024  }
  0xd9   : > { %2296 = vsyncadd (%p2958_p12), [#allocation12], 4294966272  ;;  %v2021_v0 = vld [vmem:[#allocation7] sm:$0xff]   ;;  %v2022_v1 = vld [vmem:[#allocation7 + $0x8] sm:$0xff]   ;;  %s2959_s28 = sld [smem:[#allocation26_spill]]  ;;  %s2841_s6 = scalar_lea.vmem [#allocation13], %s1609_s4 }
  0xda   : > { %1747 = vmatprep.subr.bf16.mxu0 %v2021_v0  ;;  %v2023_v2 = vld [vmem:[#allocation7 + $0x10] sm:$0xff]   ;;  %v2024_v3 = vld [vmem:[#allocation7 + $0x18] sm:$0xff]   ;;  %v2686_v4 = vld [vmem:[%s2667_s9] sm:$0xff]  ;;  %s1666_s13 = sshll.u32 %s2406_s17, 11  ;;  %s1460_s11 = sshll.u32 %s2841_s6, 4  ;;  %s2863_s11 = int_to_ptr.vmem [resolvable:$true] %s1460_s11 }
  0xdb   : > { %1748 = vmatpush3.bf16.msra.mxu0 %v2021_v0  ;;  %v2689_v5 = vld [vmem:[%s2667_s9 + $0x8] sm:$0xff]  ;;  %v2025_v7 = vld [vmem:[#allocation7 + $0x20] sm:$0xff]   ;;  %v2027_v9 = vld [vmem:[#allocation7 + $0x30] sm:$0xff]   ;;  %s2960_s0 = sld [smem:[#allocation27_spill]]  ;;  %s1447_s17 = scalar_lea.sflag [#allocation4], %s2653_s24 }
  0xdc   : > { %1749 = vmatprep.subr.bf16.mxu0 %v2022_v1  ;;  %v493_v6 = vpack.c.bf16 %v2689_v5, %v2686_v4  ;;  %v2026_v8 = vld [vmem:[#allocation7 + $0x28] sm:$0xff]   ;;  %v2028_v10 = vld [vmem:[#allocation7 + $0x38] sm:$0xff]   ;;  %v2694_v11 = vld [vmem:[%s2667_s9 + $0x10] sm:$0xff]  ;;  %s2233_s21 = scalar_lea.vmem %s2863_s11, 2048 }
  0xdd   : > { %v2697_v12 = vld [vmem:[%s2667_s9 + $0x18] sm:$0xff]  ;;  %v2700_v13 = vld [vmem:[%s2667_s9 + $0x20] sm:$0xff]  ;;  %v2703_v14 = vld [vmem:[%s2667_s9 + $0x28] sm:$0xff]  ;;  %p2234_p13 = scmp.ne.s32.totalorder %s2863_s11, %s2233_s21 }
  0xde   : > { %1763 = vmatprep.mubr.bf16.mxu0 %v493_v6  ;;  %v494_v15 = vpack.c.bf16 %v2697_v12, %v2694_v11  ;;  %v495_v16 = vpack.c.bf16 %v2703_v14, %v2700_v13  ;;  %v2710_v17 = vld [vmem:[%s2667_s9 + $0x30] sm:$0xff]  ;;  %v2713_v18 = vld [vmem:[%s2667_s9 + $0x38] sm:$0xff]  ;;  %v2716_v19 = vld [vmem:[%s2667_s9 + $0x40] sm:$0xff] }
  0xdf   : > { %1750 = vmatpush3.bf16.msra.mxu0 %v2022_v1  ;;  %v2719_v20 = vld [vmem:[%s2667_s9 + $0x48] sm:$0xff]  ;;  %v496_v21 = vpack.c.bf16 %v2713_v18, %v2710_v17  ;;  %v2726_v23 = vld [vmem:[%s2667_s9 + $0x50] sm:$0xff]  ;;  %v2729_v24 = vld [vmem:[%s2667_s9 + $0x58] sm:$0xff]  ;;  %p2235_p4 = pnand %p2234_p13, %p2555_p0 }
  0xe0   : > { %1751 = vmatprep.subr.bf16.mxu0 %v2023_v2  ;;  %v497_v22 = vpack.c.bf16 %v2719_v20, %v2716_v19  ;;  %v2732_v25 = vld [vmem:[%s2667_s9 + $0x60] sm:$0xff]  ;;  %v2735_v26 = vld [vmem:[%s2667_s9 + $0x68] sm:$0xff]  ;;  %v498_v27 = vpack.c.bf16 %v2729_v24, %v2726_v23  ;;  %v2742_v29 = vld [vmem:[%s2667_s9 + $0x70] sm:$0xff] }
  0xe1   : > { %v499_v28 = vpack.c.bf16 %v2735_v26, %v2732_v25  ;;  %v2745_v30 = vld [vmem:[%s2667_s9 + $0x78] sm:$0xff]  ;;  %v2029_v32 = vld [vmem:[%s2657_s23] sm:$0xff]   ;;  %v2038_v34 = vld [vmem:[#allocation8 + $0x8] sm:$0xff]   ;;  %s2861_s4 = scalar_lea.hbm %s2960_s0, %s1666_s13  ;;  %p2236_p6 = pneg %p2235_p4 }
  0xe2   : > { %v500_v31 = vpack.c.bf16 %v2745_v30, %v2742_v29  ;;  %1795 = vmatprep.mubr.bf16.mxu1 %v2029_v32  ;;  %v2037_v33 = vld [vmem:[#allocation8] sm:$0xff]   ;;  %v2039_v35 = vld [vmem:[#allocation8 + $0x10] sm:$0xff]   ;;  %v2040_v36 = vld [vmem:[#allocation8 + $0x18] sm:$0xff]   ;;  %s2327_s9 = smov [#allocation13]  }
  0xe3   : > { %1752 = vmatpush3.bf16.msra.mxu0 %v2023_v2  ;;  %v2041_v37 = vld [vmem:[#allocation8 + $0x20] sm:$0xff]   ;;  %v2030_v62 = vld [vmem:[%s2657_s23 + $0x8] sm:$0xff]   ;;  %v2031_v63 = vld [vmem:[%s2657_s23 + $0x10] sm:$0xff]   ;;  %s2237_s19 = sshll.u32 %s2327_s9, 4  ;;  %s2238_s19 = int_to_ptr.vmem [resolvable:$false] %s2237_s19 }
  0xe4   : > { %1753 = vmatprep.subr.bf16.mxu0 %v2024_v3  ;;  %v2032_v0 = vld [vmem:[%s2657_s23 + $0x18] sm:$0xff]   ;;  %v2033_v1 = vld [vmem:[%s2657_s23 + $0x20] sm:$0xff]   ;;  %v2034_v2 = vld [vmem:[%s2657_s23 + $0x28] sm:$0xff]   ;;  %s2239_s25 = scalar_lea.vmem %s2238_s19, 4096  ;;  %p2240_p3 = scmp.lt.s32.totalorder %s2863_s11, %s2238_s19 }
  0xe5   : > { %v2036_v6 = vld [vmem:[%s2657_s23 + $0x38] sm:$0xff]   ;;  %p2241_p5 = scmp.lt.s32.totalorder %s2239_s25, %s2233_s21 }
  0xe7   : > { %1754 = vmatpush3.bf16.msra.mxu0 %v2024_v3  ;;  %v2035_v3 = vld [vmem:[%s2657_s23 + $0x30] sm:$0xff]   ;;  %p2242_p9 = por %p2241_p5, %p2240_p3 }
  0xe8   : > { %1755 = vmatprep.subr.bf16.mxu0 %v2025_v7 }
  0xe9   : > { %p2243_p8 = pnand %p2242_p9, %p2236_p6 }
  0xeb   : > { %1756 = vmatpush3.bf16.msra.mxu0 %v2025_v7  ;;  %v2042_v7 = vld [vmem:[#allocation8 + $0x28] sm:$0xff]  }
  0xec   : > { %1757 = vmatprep.subr.bf16.mxu0 %v2026_v8 }
  0xef   : > { %1758 = vmatpush3.bf16.msra.mxu0 %v2026_v8  ;;  %v2043_v8 = vld [vmem:[#allocation8 + $0x30] sm:$0xff]  }
  0xf0   : > { %1759 = vmatprep.subr.bf16.mxu0 %v2027_v9 }
  0xf3   : > { %1760 = vmatpush3.bf16.msra.mxu0 %v2027_v9  ;;  %v2044_v9 = vld [vmem:[#allocation8 + $0x38] sm:$0xff]  }
  0xf4   : > { %1761 = vmatprep.subr.bf16.mxu0 %v2028_v10 }
  0xf7   : > { %1762 = vmatpush3.bf16.msra.mxu0 %v2028_v10  ;;  %v2045_v10 = vld [vmem:[#allocation10] sm:$0xff]  }
  0xf8   : > { %1811 = vmatprep.subr.bf16.mxu0 %v2037_v33 }
  0xfa   : > { %1764 = vmatmul.mubr.bf16.vlgmr.msra.gmra.mrb[0].mxu0 %v494_v15  ;;  %v2046_v15 = vld [vmem:[#allocation10 + $0x8] sm:$0xff]  }
  0xfb   : > { %1767 = vmatprep.mubr.bf16.mxu0 %v495_v16  ;;  %1812 = vmatpush3.bf16.msra.mxu0 %v2037_v33  ;;  %v2047_v16 = vld [vmem:[#allocation10 + $0x10] sm:$0xff]  }
  0xfc   : > { %1813 = vmatprep.subr.bf16.mxu0 %v2038_v34 }
  0xff   : > { %1814 = vmatpush3.bf16.msra.mxu0 %v2038_v34 }
 0x100   : > { %1815 = vmatprep.subr.bf16.mxu0 %v2039_v35 }
 0x102   : > { %1768 = vmatmul.mubr.bf16.gmra.mrb[4].mxu0 %v496_v21  ;;  %v2048_v21 = vld [vmem:[#allocation10 + $0x18] sm:$0xff]  }
 0x103   : > { %1771 = vmatprep.mubr.bf16.mxu0 %v497_v22  ;;  %1816 = vmatpush3.bf16.msra.mxu0 %v2039_v35  ;;  %v2049_v22 = vld [vmem:[#allocation10 + $0x20] sm:$0xff]  }
 0x104   : > { %1817 = vmatprep.subr.bf16.mxu0 %v2040_v36 }
 0x107   : > { %1818 = vmatpush3.bf16.msra.mxu0 %v2040_v36 }
 0x108   : > { %1819 = vmatprep.subr.bf16.mxu0 %v2041_v37 }
 0x10a   : > { %1772 = vmatmul.mubr.bf16.gmra.mrb[8].mxu0 %v498_v27  ;;  %v2050_v27 = vld [vmem:[#allocation10 + $0x28] sm:$0xff]  }
 0x10b   : > { %1775 = vmatprep.mubr.bf16.mxu0 %v499_v28  ;;  %1820 = vmatpush3.bf16.msra.mxu0 %v2041_v37  ;;  %v2760_v28 = vld [vmem:[%s2912_s3] ss:$0 sm:$0xff] }
 0x10c   : > { %1821 = vmatprep.subr.bf16.mxu0 %v2042_v7 }
 0x10f   : > { %1822 = vmatpush3.bf16.msra.mxu0 %v2042_v7 }
 0x110   : > { %1823 = vmatprep.subr.bf16.mxu0 %v2043_v8 }
 0x112   : > { %1776 = vmatmul.mubr.bf16.gmra.mrb[12].mxu0 %v500_v31 }
 0x113   : > { %1824 = vmatpush3.bf16.msra.mxu0 %v2043_v8 }
 0x114   : > { %1825 = vmatprep.subr.bf16.mxu0 %v2044_v9 }
 0x117   : > { %1826 = vmatpush3.bf16.msra.mxu0 %v2044_v9 }
 0x1cd   : > { %v1765_v38 = vpop.f32.mrb[0].mxu0 }
 0x1ce   : > { %v615_v39 = vpop.f32.mrb[1].mxu0 }
 0x1cf   : > { %v1766_v40 = vpop.f32.mrb[2].mxu0 }
 0x1d0   : > { %v679_v41 = vpack.c.bf16 %v1766_v40, %v1765_v38  ;;  %v618_v42 = vpop.f32.mrb[3].mxu0 }
 0x1d1   : > { %v678_v43 = vpack.c.bf16 %v618_v42, %v615_v39 }
 0x1d3   : > { %1779 = vmatprep.subr.bf16.mxu1 %v678_v43 }
 0x1d4   : > { %1780 = vmatpush3.bf16.msra.mxu1 %v678_v43 }
 0x1d5   : > { %v1769_v44 = vpop.f32.mrb[4].mxu0  ;;  %1781 = vmatprep.subr.bf16.mxu1 %v679_v41 }
 0x1d6   : > { %v631_v45 = vpop.f32.mrb[5].mxu0 }
 0x1d7   : > { %v1770_v46 = vpop.f32.mrb[6].mxu0 }
 0x1d8   : > { %v681_v47 = vpack.c.bf16 %v1770_v46, %v1769_v44  ;;  %v634_v48 = vpop.f32.mrb[7].mxu0  ;;  %1782 = vmatpush3.bf16.msra.mxu1 %v679_v41 }
 0x1d9   : > { %v680_v49 = vpack.c.bf16 %v634_v48, %v631_v45 }
 0x1db   : > { %1783 = vmatprep.subr.bf16.mxu1 %v680_v49 }
 0x1dc   : > { %1784 = vmatpush3.bf16.msra.mxu1 %v680_v49 }
 0x1dd   : > { %v1773_v50 = vpop.f32.mrb[8].mxu0  ;;  %1785 = vmatprep.subr.bf16.mxu1 %v681_v47 }
 0x1de   : > { %v647_v51 = vpop.f32.mrb[9].mxu0 }
 0x1df   : > { %v1774_v52 = vpop.f32.mrb[10].mxu0 }
 0x1e0   : > { %v683_v53 = vpack.c.bf16 %v1774_v52, %v1773_v50  ;;  %v650_v54 = vpop.f32.mrb[11].mxu0  ;;  %1786 = vmatpush3.bf16.msra.mxu1 %v681_v47 }
 0x1e1   : > { %v682_v55 = vpack.c.bf16 %v650_v54, %v647_v51 }
 0x1e3   : > { %1787 = vmatprep.subr.bf16.mxu1 %v682_v55 }
 0x1e4   : > { %1788 = vmatpush3.bf16.msra.mxu1 %v682_v55 }
 0x1e5   : > { %v1777_v56 = vpop.f32.mrb[12].mxu0  ;;  %1789 = vmatprep.subr.bf16.mxu1 %v683_v53 }
 0x1e6   : > { %v663_v57 = vpop.f32.mrb[13].mxu0 }
 0x1e7   : > { %v1778_v58 = vpop.f32.mrb[14].mxu0 }
 0x1e8   : > { %v685_v59 = vpack.c.bf16 %v1778_v58, %v1777_v56  ;;  %v666_v60 = vpop.f32.mrb[15].mxu0  ;;  %1790 = vmatpush3.bf16.msra.mxu1 %v683_v53 }
 0x1e9   : > { %v684_v61 = vpack.c.bf16 %v666_v60, %v663_v57 }
 0x1eb   : > { %1791 = vmatprep.subr.bf16.mxu1 %v684_v61 }
 0x1ec   : > { %1792 = vmatpush3.bf16.msra.mxu1 %v684_v61 }
 0x1ed   : > { %1793 = vmatprep.subr.bf16.mxu1 %v685_v59 }
 0x1f0   : > { %1794 = vmatpush3.bf16.msra.mxu1 %v685_v59 }
 0x1f1   : > { %1843 = vmatprep.subr.bf16.mxu1 %v2045_v10 }
 0x1f3   : > { %1796 = vmatmul.mubr.bf16.vlgmr.msra.gmra.mrb[0].mxu1 %v2030_v62 }
 0x1f4   : > { %1799 = vmatprep.mubr.bf16.mxu1 %v2031_v63  ;;  %1844 = vmatpush3.bf16.msra.mxu1 %v2045_v10 }
 0x1f5   : > { %1845 = vmatprep.subr.bf16.mxu1 %v2046_v15 }
 0x1f8   : > { %1846 = vmatpush3.bf16.msra.mxu1 %v2046_v15 }
 0x1f9   : > { %1847 = vmatprep.subr.bf16.mxu1 %v2047_v16 }
 0x1fb   : > { %1800 = vmatmul.mubr.bf16.gmra.mrb[4].mxu1 %v2032_v0 }
 0x1fc   : > { %1803 = vmatprep.mubr.bf16.mxu1 %v2033_v1  ;;  %1848 = vmatpush3.bf16.msra.mxu1 %v2047_v16 }
 0x1fd   : > { %1849 = vmatprep.subr.bf16.mxu1 %v2048_v21 }
 0x200   : > { %1850 = vmatpush3.bf16.msra.mxu1 %v2048_v21 }
 0x201   : > { %1851 = vmatprep.subr.bf16.mxu1 %v2049_v22 }
 0x203   : > { %1804 = vmatmul.mubr.bf16.gmra.mrb[8].mxu1 %v2034_v2 }
 0x204   : > { %1807 = vmatprep.mubr.bf16.mxu1 %v2035_v3  ;;  %1852 = vmatpush3.bf16.msra.mxu1 %v2049_v22 }
 0x205   : > { %1853 = vmatprep.subr.bf16.mxu1 %v2050_v27 }
 0x208   : > { %1854 = vmatpush3.bf16.msra.mxu1 %v2050_v27 }
 0x20b   : > { %1808 = vmatmul.mubr.bf16.gmra.mrb[12].mxu1 %v2036_v6 }
 0x2c6   : > { %v1797_v31 = vpop.f32.mrb[0].mxu1 }
 0x2c7   : > { %v784_v32 = vadd.f32 %v1797_v31, %v2760_v28  ;;  %v775_v33 = vpop.f32.mrb[1].mxu1 }
 0x2c8   : > { %v776_v34 = vadd.f32 %v2760_v28, %v775_v33  ;;  %v1798_v35 = vpop.f32.mrb[2].mxu1 }
 0x2c9   : > { %v840_v36 = vmax.f32 %v784_v32, 0.0  ;;  %v787_v37 = vadd.f32 %v1798_v35, %v2760_v28  ;;  %v778_v38 = vpop.f32.mrb[3].mxu1 }
 0x2ca   : > { %v838_v39 = vmax.f32 %v776_v34, 0.0  ;;  %v779_v40 = vadd.f32 %v2760_v28, %v778_v38 }
 0x2cb   : > { %v841_v41 = vmax.f32 %v787_v37, 0.0  ;;  %v856_v43 = vadd.f32 %v840_v36, %v2694_v11 }
 0x2cc   : > { %v839_v42 = vmax.f32 %v779_v40, 0.0  ;;  %v854_v45 = vadd.f32 %v838_v39, %v2686_v4 }
 0x2cd   : > { %v857_v44 = vadd.f32 %v841_v41, %v2697_v12 }
 0x2ce   : > { %v855_v46 = vadd.f32 %v839_v42, %v2689_v5  ;;  %v1801_v47 = vpop.f32.mrb[4].mxu1 }
 0x2cf   : > { %v871_v48 = vpack.c.bf16 %v857_v44, %v856_v43  ;;  %v800_v49 = vadd.f32 %v1801_v47, %v2760_v28  ;;  %v791_v50 = vpop.f32.mrb[5].mxu1  ;;  %v2051_v44 = vld [vmem:[#allocation10 + $0x30] sm:$0xff]   ;;  %v2809_v47 = vld [vmem:[%s2914_s5] ss:$0 sm:$0xff] }
 0x2d0   : > { %v792_v51 = vadd.f32 %v2760_v28, %v791_v50  ;;  %v1802_v52 = vpop.f32.mrb[6].mxu1  ;;  %v870_v53 = vpack.c.bf16 %v855_v46, %v854_v45  ;;  %1855 = vmatprep.subr.bf16.mxu1 %v2051_v44  ;;  %v2053_v45 = vld [vmem:[#allocation11] sm:$0xff]   ;;  %v2054_v46 = vld [vmem:[#allocation11 + $0x8] sm:$0xff]  }
 0x2d1   : > { %v844_v54 = vmax.f32 %v800_v49, 0.0  ;;  %v803_v55 = vadd.f32 %v1802_v52, %v2760_v28  ;;  %v794_v56 = vpop.f32.mrb[7].mxu1  ;;  %1856 = vmatpush3.bf16.msra.mxu1 %v2051_v44  ;;  %1875 = vmatprep.subr.bf16.mxu0 %v2053_v45 }
 0x2d2   : > { %v842_v11 = vmax.f32 %v792_v51, 0.0  ;;  %v795_v12 = vadd.f32 %v2760_v28, %v794_v56  ;;  %1827 = vmatprep.mubr.bf16.mxu0 %v870_v53 }
 0x2d3   : > { %v845_v4 = vmax.f32 %v803_v55, 0.0  ;;  %1828 = vmatmul.mubr.bf16.vlgmr.msra.gmra.mrb[16].mxu0 %v871_v48  ;;  %v860_v57 = vadd.f32 %v844_v54, %v2710_v17 }
 0x2d4   : > { %v843_v5 = vmax.f32 %v795_v12, 0.0  ;;  %v858_v59 = vadd.f32 %v842_v11, %v2700_v13  ;;  %1876 = vmatpush3.bf16.msra.mxu0 %v2053_v45 }
 0x2d5   : > { %v861_v58 = vadd.f32 %v845_v4, %v2713_v18  ;;  %1877 = vmatprep.subr.bf16.mxu0 %v2054_v46 }
 0x2d6   : > { %v859_v60 = vadd.f32 %v843_v5, %v2703_v14  ;;  %v1805_v61 = vpop.f32.mrb[8].mxu1 }
 0x2d7   : > { %v816_v62 = vadd.f32 %v1805_v61, %v2760_v28  ;;  %v807_v63 = vpop.f32.mrb[9].mxu1  ;;  %v873_v0 = vpack.c.bf16 %v861_v58, %v860_v57 }
 0x2d8   : > { %v808_v1 = vadd.f32 %v2760_v28, %v807_v63  ;;  %v1806_v2 = vpop.f32.mrb[10].mxu1  ;;  %v872_v3 = vpack.c.bf16 %v859_v60, %v858_v59  ;;  %1878 = vmatpush3.bf16.msra.mxu0 %v2054_v46 }
 0x2d9   : > { %v848_v6 = vmax.f32 %v816_v62, 0.0  ;;  %v819_v7 = vadd.f32 %v1806_v2, %v2760_v28  ;;  %v810_v8 = vpop.f32.mrb[11].mxu1 }
 0x2da   : > { %v846_v17 = vmax.f32 %v808_v1, 0.0  ;;  %v811_v18 = vadd.f32 %v2760_v28, %v810_v8  ;;  %1831 = vmatprep.mubr.bf16.mxu0 %v872_v3 }
 0x2db   : > { %v849_v13 = vmax.f32 %v819_v7, 0.0  ;;  %1832 = vmatmul.mubr.bf16.gmra.mrb[20].mxu0 %v873_v0  ;;  %v864_v9 = vadd.f32 %v848_v6, %v2726_v23 }
 0x2dc   : > { %v847_v14 = vmax.f32 %v811_v18, 0.0  ;;  %v862_v15 = vadd.f32 %v846_v17, %v2716_v19 }
 0x2dd   : > { %v865_v10 = vadd.f32 %v849_v13, %v2729_v24 }
 0x2de   : > { %v863_v16 = vadd.f32 %v847_v14, %v2719_v20  ;;  %v1809_v21 = vpop.f32.mrb[12].mxu1 }
 0x2df   : > { %v832_v22 = vadd.f32 %v1809_v21, %v2760_v28  ;;  %v823_v27 = vpop.f32.mrb[13].mxu1  ;;  %v875_v31 = vpack.c.bf16 %v865_v10, %v864_v9 }
 0x2e0   : > { %v824_v32 = vadd.f32 %v2760_v28, %v823_v27  ;;  %v1810_v33 = vpop.f32.mrb[14].mxu1  ;;  %v874_v34 = vpack.c.bf16 %v863_v16, %v862_v15 }
 0x2e1   : > { %v852_v35 = vmax.f32 %v832_v22, 0.0  ;;  %v835_v36 = vadd.f32 %v1810_v33, %v2760_v28  ;;  %v826_v37 = vpop.f32.mrb[15].mxu1 }
 0x2e2   : > { %v850_v23 = vmax.f32 %v824_v32, 0.0  ;;  %v827_v24 = vadd.f32 %v2760_v28, %v826_v37  ;;  %1835 = vmatprep.mubr.bf16.mxu0 %v874_v34  ;;  %v2052_v28 = vld [vmem:[#allocation10 + $0x38] sm:$0xff]  }
 0x2e3   : > { %v853_v19 = vmax.f32 %v835_v36, 0.0  ;;  %1836 = vmatmul.mubr.bf16.gmra.mrb[24].mxu0 %v875_v31  ;;  %v868_v38 = vadd.f32 %v852_v35, %v2742_v29  ;;  %1857 = vmatprep.subr.bf16.mxu1 %v2052_v28  ;;  %v2055_v29 = vld [vmem:[#allocation11 + $0x10] sm:$0xff]  }
 0x2e4   : > { %v851_v20 = vmax.f32 %v827_v24, 0.0  ;;  %v866_v40 = vadd.f32 %v850_v23, %v2732_v25  ;;  %1858 = vmatpush3.bf16.msra.mxu1 %v2052_v28  ;;  %1879 = vmatprep.subr.bf16.mxu0 %v2055_v29  ;;  %v2794_v25 = vld [vmem:[#allocation11 + $0x18] sm:$0xff]   ;;  %v2059_v28 = vld [vmem:[#allocation11 + $0x30] sm:$0xff]  }
 0x2e5   : > { %v869_v39 = vadd.f32 %v853_v19, %v2745_v30  ;;  %1907 = vmatprep.subr.bf16.mxu1 %v2053_v45  ;;  %1880 = vmatpush3.bf16.msra.mxu0 %v2055_v29  ;;  %v2801_v30 = vld [vmem:[#allocation11 + $0x28] sm:$0xff]  }
 0x2e6   : > { %v867_v41 = vadd.f32 %v851_v20, %v2735_v26  ;;  %1881 = vmatprep.subr.bf16.mxu0 %v2794_v25  ;;  %v2797_v26 = vld [vmem:[#allocation11 + $0x20] sm:$0xff]  }
 0x2e7   : > { %v877_v42 = vpack.c.bf16 %v869_v39, %v868_v38 }
 0x2e8   : > { %v876_v43 = vpack.c.bf16 %v867_v41, %v866_v40 }
 0x2e9   : > { %1882 = vmatpush3.bf16.msra.mxu0 %v2794_v25 }
 0x2ea   : > { %1839 = vmatprep.mubr.bf16.mxu0 %v876_v43  ;;  %1883 = vmatprep.subr.bf16.mxu0 %v2797_v26 }
 0x2eb   : > { %1840 = vmatmul.mubr.bf16.gmra.mrb[28].mxu0 %v877_v42 }
 0x2ed   : > { %1884 = vmatpush3.bf16.msra.mxu0 %v2797_v26 }
 0x2ee   : > { %1885 = vmatprep.subr.bf16.mxu0 %v2801_v30 }
 0x2f1   : > { %1886 = vmatpush3.bf16.msra.mxu0 %v2801_v30 }
 0x2f2   : > { %1887 = vmatprep.subr.bf16.mxu0 %v2059_v28 }
 0x2f5   : > { %1888 = vmatpush3.bf16.msra.mxu0 %v2059_v28 }
 0x3a6   : > { %v1829_v48 = vpop.f32.mrb[16].mxu0 }
 0x3a7   : > { %v992_v49 = vadd.f32 %v1829_v48, %v2809_v47  ;;  %v983_v50 = vpop.f32.mrb[17].mxu0 }
 0x3a8   : > { %v984_v51 = vadd.f32 %v2809_v47, %v983_v50  ;;  %v1830_v52 = vpop.f32.mrb[18].mxu0 }
 0x3a9   : > { %v995_v53 = vadd.f32 %v1830_v52, %v2809_v47  ;;  %v986_v54 = vpop.f32.mrb[19].mxu0  ;;  %v1048_v56 = vmax.f32 %v992_v49, 0.0 }
 0x3aa   : > { %v987_v55 = vadd.f32 %v2809_v47, %v986_v54  ;;  %v1046_v12 = vmax.f32 %v984_v51, 0.0 }
 0x3ab   : > { %v1049_v11 = vmax.f32 %v995_v53, 0.0 }
 0x3ac   : > { %v1047_v4 = vmax.f32 %v987_v55, 0.0 }
 0x3ad   : > { %v1063_v5 = vpack.c.bf16 %v1049_v11, %v1048_v56 }
 0x3ae   : > { %v1062_v57 = vpack.c.bf16 %v1047_v4, %v1046_v12  ;;  %v1833_v58 = vpop.f32.mrb[20].mxu0 }
 0x3af   : > { %v1008_v59 = vadd.f32 %v1833_v58, %v2809_v47  ;;  %v999_v60 = vpop.f32.mrb[21].mxu0 }
 0x3b0   : > { %v1000_v61 = vadd.f32 %v2809_v47, %v999_v60  ;;  %v1834_v62 = vpop.f32.mrb[22].mxu0  ;;  %1859 = vmatprep.mubr.bf16.mxu1 %v1062_v57 }
 0x3b1   : > { %v1011_v63 = vadd.f32 %v1834_v62, %v2809_v47  ;;  %v1002_v0 = vpop.f32.mrb[23].mxu0  ;;  %1860 = vmatmul.mubr.bf16.vlgmr.msra.gmra.mrb[16].mxu1 %v1063_v5  ;;  %v1052_v2 = vmax.f32 %v1008_v59, 0.0 }
 0x3b2   : > { %v1003_v1 = vadd.f32 %v2809_v47, %v1002_v0  ;;  %1915 = vmatpush3.bf16.msra.mxu1 %v2053_v45  ;;  %v1050_v6 = vmax.f32 %v1000_v61, 0.0  ;;  %v2060_v45 = vld [vmem:[#allocation11 + $0x38] sm:$0xff]  }
 0x3b3   : > { %v1053_v3 = vmax.f32 %v1011_v63, 0.0  ;;  %1908 = vmatprep.subr.bf16.mxu1 %v2054_v46  ;;  %1889 = vmatprep.subr.bf16.mxu0 %v2060_v45 }
 0x3b4   : > { %v1051_v7 = vmax.f32 %v1003_v1, 0.0  ;;  %1890 = vmatpush3.bf16.msra.mxu0 %v2060_v45 }
 0x3b5   : > { %v1065_v8 = vpack.c.bf16 %v1053_v3, %v1052_v2 }
 0x3b6   : > { %v1064_v17 = vpack.c.bf16 %v1051_v7, %v1050_v6  ;;  %v1837_v18 = vpop.f32.mrb[24].mxu0  ;;  %1916 = vmatpush3.bf16.msra.mxu1 %v2054_v46  ;;  %v1641_v46 = vld [vmem:[%s2916_s7] ss:$0 sm:$0xff] }
 0x3b7   : > { %v1024_v13 = vadd.f32 %v1837_v18, %v2809_v47  ;;  %v1015_v14 = vpop.f32.mrb[25].mxu0  ;;  %1909 = vmatprep.subr.bf16.mxu1 %v2055_v29 }
 0x3b8   : > { %v1016_v9 = vadd.f32 %v2809_v47, %v1015_v14  ;;  %v1838_v10 = vpop.f32.mrb[26].mxu0  ;;  %1863 = vmatprep.mubr.bf16.mxu1 %v1064_v17 }
 0x3b9   : > { %v1027_v15 = vadd.f32 %v1838_v10, %v2809_v47  ;;  %v1018_v16 = vpop.f32.mrb[27].mxu0  ;;  %1864 = vmatmul.mubr.bf16.gmra.mrb[20].mxu1 %v1065_v8  ;;  %v1056_v22 = vmax.f32 %v1024_v13, 0.0 }
 0x3ba   : > { %v1019_v21 = vadd.f32 %v2809_v47, %v1018_v16  ;;  %1917 = vmatpush3.bf16.msra.mxu1 %v2055_v29  ;;  %v1054_v31 = vmax.f32 %v1016_v9, 0.0 }
 0x3bb   : > { %v1057_v27 = vmax.f32 %v1027_v15, 0.0  ;;  %1910 = vmatprep.subr.bf16.mxu1 %v2794_v25 }
 0x3bc   : > { %v1055_v32 = vmax.f32 %v1019_v21, 0.0 }
 0x3bd   : > { %v1067_v33 = vpack.c.bf16 %v1057_v27, %v1056_v22 }
 0x3be   : > { %v1066_v34 = vpack.c.bf16 %v1055_v32, %v1054_v31  ;;  %v1841_v35 = vpop.f32.mrb[28].mxu0  ;;  %1918 = vmatpush3.bf16.msra.mxu1 %v2794_v25 }
 0x3bf   : > { %v1040_v36 = vadd.f32 %v1841_v35, %v2809_v47  ;;  %v1031_v37 = vpop.f32.mrb[29].mxu0  ;;  %1911 = vmatprep.subr.bf16.mxu1 %v2797_v26 }
 0x3c0   : > { %v1032_v23 = vadd.f32 %v2809_v47, %v1031_v37  ;;  %v1842_v24 = vpop.f32.mrb[30].mxu0  ;;  %1867 = vmatprep.mubr.bf16.mxu1 %v1066_v34 }
 0x3c1   : > { %v1043_v19 = vadd.f32 %v1842_v24, %v2809_v47  ;;  %v1034_v20 = vpop.f32.mrb[31].mxu0  ;;  %1868 = vmatmul.mubr.bf16.gmra.mrb[24].mxu1 %v1067_v33  ;;  %v1060_v39 = vmax.f32 %v1040_v36, 0.0 }
 0x3c2   : > { %v1035_v38 = vadd.f32 %v2809_v47, %v1034_v20  ;;  %1919 = vmatpush3.bf16.msra.mxu1 %v2797_v26  ;;  %v1058_v41 = vmax.f32 %v1032_v23, 0.0 }
 0x3c3   : > { %v1061_v40 = vmax.f32 %v1043_v19, 0.0  ;;  %1912 = vmatprep.subr.bf16.mxu1 %v2801_v30 }
 0x3c4   : > { %v1059_v42 = vmax.f32 %v1035_v38, 0.0 }
 0x3c5   : > { %v1069_v43 = vpack.c.bf16 %v1061_v40, %v1060_v39  ;;  %v1650_v40 = vld [vmem:[%s2959_s28] ss:$0 sm:$0xff] }
 0x3c6   : > { %v1068_v44 = vpack.c.bf16 %v1059_v42, %v1058_v41  ;;  %1920 = vmatpush3.bf16.msra.mxu1 %v2801_v30 }
 0x3c7   : > { %1913 = vmatprep.subr.bf16.mxu1 %v2059_v28 }
 0x3c8   : > { %1871 = vmatprep.mubr.bf16.mxu1 %v1068_v44 }
 0x3c9   : > { %1872 = vmatmul.mubr.bf16.gmra.mrb[28].mxu1 %v1069_v43 }
 0x3ca   : > { %1921 = vmatpush3.bf16.msra.mxu1 %v2059_v28 }
 0x3cb   : > { %1914 = vmatprep.subr.bf16.mxu1 %v2060_v45 }
 0x3ce   : > { %1922 = vmatpush3.bf16.msra.mxu1 %v2060_v45 }
 0x484   : > { %v1861_v29 = vpop.f32.mrb[16].mxu1 }
 0x485   : > { %v1184_v25 = vadd.f32 %v1861_v29, %v1641_v46  ;;  %v1175_v26 = vpop.f32.mrb[17].mxu1 }
 0x486   : > { %v1176_v30 = vadd.f32 %v1641_v46, %v1175_v26  ;;  %v1862_v47 = vpop.f32.mrb[18].mxu1 }
 0x487   : > { %v1187_v48 = vadd.f32 %v1862_v47, %v1641_v46  ;;  %v1178_v49 = vpop.f32.mrb[19].mxu1  ;;  %v1240_v51 = vmax.f32 %v1184_v25, 0.0 }
 0x488   : > { %v1179_v50 = vadd.f32 %v1641_v46, %v1178_v49  ;;  %v1238_v53 = vmax.f32 %v1176_v30, 0.0 }
 0x489   : > { %v1241_v52 = vmax.f32 %v1187_v48, 0.0 }
 0x48a   : > { %v1239_v54 = vmax.f32 %v1179_v50, 0.0 }
 0x48b   : > { %v1255_v55 = vpack.c.bf16 %v1241_v52, %v1240_v51 }
 0x48c   : > { %v1254_v56 = vpack.c.bf16 %v1239_v54, %v1238_v53  ;;  %v1865_v11 = vpop.f32.mrb[20].mxu1 }
 0x48d   : > { %v1200_v12 = vadd.f32 %v1865_v11, %v1641_v46  ;;  %v1191_v4 = vpop.f32.mrb[21].mxu1 }
 0x48e   : > { %v1192_v5 = vadd.f32 %v1641_v46, %v1191_v4  ;;  %v1866_v57 = vpop.f32.mrb[22].mxu1  ;;  %1891 = vmatprep.mubr.bf16.mxu0 %v1254_v56 }
 0x48f   : > { %v1203_v58 = vadd.f32 %v1866_v57, %v1641_v46  ;;  %v1194_v59 = vpop.f32.mrb[23].mxu1  ;;  %1892 = vmatmul.mubr.bf16.vlgmr.msra.gmra.mrb[32].mxu0 %v1255_v55  ;;  %v1244_v61 = vmax.f32 %v1200_v12, 0.0 }
 0x490   : > { %v1195_v60 = vadd.f32 %v1641_v46, %v1194_v59  ;;  %v1242_v63 = vmax.f32 %v1192_v5, 0.0 }
 0x491   : > { %v1245_v62 = vmax.f32 %v1203_v58, 0.0 }
 0x492   : > { %v1243_v0 = vmax.f32 %v1195_v60, 0.0 }
 0x493   : > { %v1257_v1 = vpack.c.bf16 %v1245_v62, %v1244_v61 }
 0x494   : > { %v1256_v2 = vpack.c.bf16 %v1243_v0, %v1242_v63  ;;  %v1869_v3 = vpop.f32.mrb[24].mxu1 }
 0x495   : > { %v1216_v6 = vadd.f32 %v1869_v3, %v1641_v46  ;;  %v1207_v7 = vpop.f32.mrb[25].mxu1 }
 0x496   : > { %v1208_v8 = vadd.f32 %v1641_v46, %v1207_v7  ;;  %v1870_v17 = vpop.f32.mrb[26].mxu1  ;;  %1895 = vmatprep.mubr.bf16.mxu0 %v1256_v2 }
 0x497   : > { %v1219_v18 = vadd.f32 %v1870_v17, %v1641_v46  ;;  %v1210_v13 = vpop.f32.mrb[27].mxu1  ;;  %1896 = vmatmul.mubr.bf16.gmra.mrb[36].mxu0 %v1257_v1  ;;  %v1248_v9 = vmax.f32 %v1216_v6, 0.0 }
 0x498   : > { %v1211_v14 = vadd.f32 %v1641_v46, %v1210_v13  ;;  %v1246_v15 = vmax.f32 %v1208_v8, 0.0 }
 0x499   : > { %v1249_v10 = vmax.f32 %v1219_v18, 0.0 }
 0x49a   : > { %v1247_v16 = vmax.f32 %v1211_v14, 0.0 }
 0x49b   : > { %v1259_v21 = vpack.c.bf16 %v1249_v10, %v1248_v9 }
 0x49c   : > { %v1258_v22 = vpack.c.bf16 %v1247_v16, %v1246_v15  ;;  %v1873_v27 = vpop.f32.mrb[28].mxu1 }
 0x49d   : > { %v1232_v31 = vadd.f32 %v1873_v27, %v1641_v46  ;;  %v1223_v32 = vpop.f32.mrb[29].mxu1 }
 0x49e   : > { %v1224_v33 = vadd.f32 %v1641_v46, %v1223_v32  ;;  %v1874_v34 = vpop.f32.mrb[30].mxu1  ;;  %1899 = vmatprep.mubr.bf16.mxu1 %v1258_v22 }
 0x49f   : > { %v1235_v35 = vadd.f32 %v1874_v34, %v1641_v46  ;;  %v1226_v36 = vpop.f32.mrb[31].mxu1  ;;  %1900 = vmatmul.mubr.bf16.vlgmr.msra.gmra.mrb[32].mxu1 %v1259_v21  ;;  %v1252_v23 = vmax.f32 %v1232_v31, 0.0 }
 0x4a0   : > { %v1227_v37 = vadd.f32 %v1641_v46, %v1226_v36  ;;  %v1250_v19 = vmax.f32 %v1224_v33, 0.0 }
 0x4a1   : > { %v1253_v24 = vmax.f32 %v1235_v35, 0.0 }
 0x4a2   : > { %v1251_v20 = vmax.f32 %v1227_v37, 0.0 }
 0x4a3   : > { %v1261_v38 = vpack.c.bf16 %v1253_v24, %v1252_v23 }
 0x4a4   : > { %v1260_v39 = vpack.c.bf16 %v1251_v20, %v1250_v19 }
 0x4a6   : > { %1903 = vmatprep.mubr.bf16.mxu1 %v1260_v39 }
 0x4a7   : > { %1904 = vmatmul.mubr.bf16.gmra.mrb[36].mxu1 %v1261_v38 }
 0x562   : > { %v1893_v41 = vpop.f32.mrb[32].mxu0 }
 0x563   : > { %v1376_v42 = vadd.f32 %v1893_v41, %v1650_v40  ;;  %v1367_v43 = vpop.f32.mrb[33].mxu0 }
 0x564   : > { %v1368_v44 = vadd.f32 %v1650_v40, %v1367_v43  ;;  %v1894_v28 = vpop.f32.mrb[34].mxu0 }
 0x565   : > { %1432 = vst [vmem:[%s2841_s6 + $0x10] sm:$0xff] %v1376_v42  ;;  %v1379_v45 = vadd.f32 %v1894_v28, %v1650_v40  ;;  %v1370_v46 = vpop.f32.mrb[35].mxu0 }
 0x566   : > { %1430 = vst [vmem:[%s2841_s6] sm:$0xff] %v1368_v44  ;;  %v1371_v29 = vadd.f32 %v1650_v40, %v1370_v46 }
 0x567   : > { %1433 = vst [vmem:[%s2841_s6 + $0x18] sm:$0xff] %v1379_v45 }
 0x568   : > { %1431 = vst [vmem:[%s2841_s6 + $0x8] sm:$0xff] %v1371_v29 }
 0x56a   : > { %v1897_v25 = vpop.f32.mrb[36].mxu0 }
 0x56b   : > { %v1392_v26 = vadd.f32 %v1897_v25, %v1650_v40  ;;  %v1383_v30 = vpop.f32.mrb[37].mxu0 }
 0x56c   : > { %v1384_v47 = vadd.f32 %v1650_v40, %v1383_v30  ;;  %v1898_v48 = vpop.f32.mrb[38].mxu0 }
 0x56d   : > { %1436 = vst [vmem:[%s2841_s6 + $0x30] sm:$0xff] %v1392_v26  ;;  %v1395_v49 = vadd.f32 %v1898_v48, %v1650_v40  ;;  %v1386_v50 = vpop.f32.mrb[39].mxu0 }
 0x56e   : > { %1434 = vst [vmem:[%s2841_s6 + $0x20] sm:$0xff] %v1384_v47  ;;  %v1387_v51 = vadd.f32 %v1650_v40, %v1386_v50 }
 0x56f   : > { %1437 = vst [vmem:[%s2841_s6 + $0x38] sm:$0xff] %v1395_v49 }
 0x570   : > { %1435 = vst [vmem:[%s2841_s6 + $0x28] sm:$0xff] %v1387_v51 }
 0x572   : > { %v1901_v52 = vpop.f32.mrb[32].mxu1 }
 0x573   : > { %v1408_v53 = vadd.f32 %v1901_v52, %v1650_v40  ;;  %v1399_v54 = vpop.f32.mrb[33].mxu1 }
 0x574   : > { %v1400_v55 = vadd.f32 %v1650_v40, %v1399_v54  ;;  %v1902_v56 = vpop.f32.mrb[34].mxu1 }
 0x575   : > { %1440 = vst [vmem:[%s2841_s6 + $0x50] sm:$0xff] %v1408_v53  ;;  %v1411_v11 = vadd.f32 %v1902_v56, %v1650_v40  ;;  %v1402_v12 = vpop.f32.mrb[35].mxu1 }
 0x576   : > { %1438 = vst [vmem:[%s2841_s6 + $0x40] sm:$0xff] %v1400_v55  ;;  %v1403_v4 = vadd.f32 %v1650_v40, %v1402_v12 }
 0x577   : > { %1441 = vst [vmem:[%s2841_s6 + $0x58] sm:$0xff] %v1411_v11 }
 0x578   : > { %1439 = vst [vmem:[%s2841_s6 + $0x48] sm:$0xff] %v1403_v4 }
 0x57a   : > { %v1905_v5 = vpop.f32.mrb[36].mxu1 }
 0x57b   : > { %v1424_v57 = vadd.f32 %v1905_v5, %v1650_v40  ;;  %v1415_v58 = vpop.f32.mrb[37].mxu1 }
 0x57c   : > { %v1416_v59 = vadd.f32 %v1650_v40, %v1415_v58  ;;  %v1906_v60 = vpop.f32.mrb[38].mxu1 }
 0x57d   : > { %1444 = vst [vmem:[%s2841_s6 + $0x70] sm:$0xff] %v1424_v57  ;;  %v1427_v61 = vadd.f32 %v1906_v60, %v1650_v40  ;;  %v1418_v62 = vpop.f32.mrb[39].mxu1 }
 0x57e   : > { %1442 = vst [vmem:[%s2841_s6 + $0x60] sm:$0xff] %v1416_v59  ;;  %v1419_v63 = vadd.f32 %v1650_v40, %v1418_v62 }
 0x57f   : > { %1445 = vst [vmem:[%s2841_s6 + $0x78] sm:$0xff] %v1427_v61 }
 0x580   : > { %1443 = vst [vmem:[%s2841_s6 + $0x68] sm:$0xff] %v1419_v63 }
 0x581   : > { %2246 = shalt.err (!%p2243_p8)
}
 0x582   : > { %s2247_s18 = scalar_lea.hbm %s2861_s4, 2048  ;;  %s2251_s2 = scalar_lea.hbm %s2960_s0, 16384 }
 0x583   : > { %p2248_p10 = scmp.ne.s32.totalorder %s2861_s4, %s2247_s18  ;;  %p2252_p1 = scmp.lt.u32.totalorder %s2861_s4, %s2960_s0 }
 0x584   : > { %p2253_p2 = scmp.lt.u32.totalorder %s2251_s2, %s2247_s18  ;;  %p2255_p13 = scmp.lt.u32.totalorder %s2247_s18, %s2861_s4 }
 0x585   : > { %p2249_p7 = pnand %p2248_p10, %p2555_p0 }
 0x586   : > { %p2254_p12 = por %p2253_p2, %p2252_p1 }
 0x587   : > { %p2250_p11 = pneg %p2249_p7 }
 0x588   : > { %p2256_p4 = por %p2255_p13, %p2254_p12 }
 0x58a   : > { %p2257_p6 = pnand %p2256_p4, %p2250_p11 }
 0x58c   : > { %2260 = shalt.err (!%p2257_p6)
}
 0x58d   : > { %s2328_s28 = smov 128   ;;  %s2329_s6 = smov 8  }
 0x58e   : > { %1943 = dma.vmem_to_hbm [thread:$0]  (%p2555_p0), %s2863_s11, 2048, %s2861_s4, %s1447_s17, %s2328_s28, %s2328_s28, %s2329_s6  }
 0x58f PF: > { %s2961_s13 = sld [smem:[#allocation20_spill]]  ;;  %s2962_s30 = sld [smem:[#allocation21_spill]] }
 0x590   : > { %p1978_p3 = scmp.ge.s32.totalorder %s2315_s16, 2 }
 0x595   : > { %s1475_s23 = sand.u32 1, %s2961_s13   ;;  %p2963_p5 = scmp.ne.s32.totalorder %s2962_s30, 0 }
 0x596   : > { %s1476_s21 = scalar_lea.sflag [#allocation4], %s1475_s23 }
 0x597   : > { %p1966_p9 = pnand %p1978_p3, %p2963_p5 }
 0x599   : > { %2298 = dma.done.wait (!%p1966_p9), %s1476_s21, 2048  }
 0x59a   : > { %2300 = vsyncadd (!%p1966_p9), %s1476_s21, 4294965248  ;;  %p28_p8 = scmp.ge.s32.totalorder %s2545_s22, 10   ;;  %s2964_s13 = smov %s2307_s14 }
 0x59b   : > { %s2965_s14 = smov %s2311_s15  ;;  %s2966_s15 = smov %s2561_s12 }
 0x59c   : > { %s2967_s16 = smov %s2545_s22  ;;  %30 = sbr.rel (!%p28_p8) target bundleno = 16 (0x10), region = 134 }
 0x5a3   :  { %1481 = vsyncpa [#allocation3], 1 }
 0x5a4   :  { %1483 = vsyncpa [#allocation3 + $0x1], 1 }
 0x5a5   :  { %1484 = vsyncpa [#allocation6], 1 }
 0x5a6   :  { %1486 = vsyncpa [#allocation6 + $0x1], 1 }
 0x5a7   :  { %1487 = vsyncpa [#allocation9], 1 }
 0x5a8   :  { %1488 = vsyncpa [#allocation12], 1 }
 0x5a9   :  { %1489 = vsyncpa [#allocation4], 1 }
 0x5aa   :  { %1491 = vsyncpa [#allocation4 + $0x1], 1 }

</bundles_post_ra>
